<compile_context>
chip_gen: v5e
topology: v5e:2x2
jax: 0.10.0
libtpu: 0.0.40
codegen_flags: <defaults>
</compile_context>

<pallas_src>
import jax
import jax.numpy as jnp
from jax.experimental import pallas as pl
from jax.experimental.pallas import tpu as pltpu


# ---------------------------------------------------------------------------
# Recommended path inside a larger jit'd model: no custom call at all, so XLA
# can fuse producer/consumer elementwise ops straight through the identity.
# ---------------------------------------------------------------------------
def identity_inline(x):
    return x


# ---------------------------------------------------------------------------
# Path 1: zero-copy alias kernel (requires the caller to donate x).
# ---------------------------------------------------------------------------
def _identity_alias_kernel(x_hbm_ref, o_hbm_ref):
    # Output buffer aliases the (donated) input buffer, so the result already
    # lives in place.  Nothing to compute and nothing to DMA.
    del x_hbm_ref, o_hbm_ref


def _identity_alias(x):
    return pl.pallas_call(
        _identity_alias_kernel,
        out_shape=jax.ShapeDtypeStruct(x.shape, x.dtype),
        # Leave both operands where they are (HBM); no auto-pipelined tiles.
        in_specs=[pl.BlockSpec(memory_space=pl.ANY)],
        out_specs=pl.BlockSpec(memory_space=pl.ANY),
        # Output 0 reuses input 0's buffer -> the "copy" is free when donated.
        input_output_aliases={0: 0},
        # Declare the call free so XLA's latency-hiding scheduler does not
        # serialize around an assumed-nonzero-cost opaque custom call.
        cost_estimate=pl.CostEstimate(flops=0, transcendentals=0, bytes_accessed=0),
    )(x)


# jit with donate_argnums=0 so the alias does not degrade into a hidden
# defensive copy (worth ~2*bytes(x) of HBM traffic otherwise, worst on v5e).
identity = jax.jit(_identity_alias, donate_argnums=0)


# ---------------------------------------------------------------------------
# Path 2: copy fallback when the input cannot be donated.  A single full-array
# HBM->HBM DMA: full HBM bandwidth, zero VMEM, zero grid overhead.
# ---------------------------------------------------------------------------
def _identity_copy_kernel(x_hbm_ref, o_hbm_ref, sem):
    cp = pltpu.make_async_copy(x_hbm_ref, o_hbm_ref, sem)
    cp.start()
    cp.wait()


def identity_copy(x):
    nbytes = x.size * x.dtype.itemsize
    return pl.pallas_call(
        _identity_copy_kernel,
        out_shape=jax.ShapeDtypeStruct(x.shape, x.dtype),
        in_specs=[pl.BlockSpec(memory_space=pl.ANY)],
        out_specs=pl.BlockSpec(memory_space=pl.ANY),
        scratch_shapes=[pltpu.SemaphoreType.DMA],
        cost_estimate=pl.CostEstimate(
            flops=0, transcendentals=0, bytes_accessed=2 * nbytes
        ),
    )(x)


if __name__ == "__main__":
    key = jax.random.PRNGKey(0)
    # Small NCHW input consistent with typical usage of this module.
    x = jax.random.normal(key, (2, 4, 16, 16), dtype=jnp.float32)

    # Keep a host-side reference BEFORE donating x (x's buffer is consumed by
    # the donated call below).
    x_host = jax.device_get(x)

    # --- Path 2 first (non-donated copy fallback), while x is still valid ---
    y_copy = identity_copy(x)
    jax.block_until_ready(y_copy)
    assert y_copy.shape == x.shape and y_copy.dtype == x.dtype
    assert bool(jnp.array_equal(y_copy, x)), "identity_copy output mismatch"

    # --- Path 1: zero-copy aliased + donated identity ---
    y = identity(x)  # donates x
    jax.block_until_ready(y)

    assert y.shape == x_host.shape, (y.shape, x_host.shape)
    assert y.dtype == x_host.dtype, (y.dtype, x_host.dtype)
    assert bool(jnp.array_equal(y, jnp.asarray(x_host))), "identity output mismatch"

    # --- Recommended in-model path (pure passthrough, no custom call) ---
    y_inline = identity_inline(y)
    assert y_inline is y

    print("KERNEL_OK")
</pallas_src>

<mosaic_0001>
module attributes {stable_mosaic.version = 11 : i64} {
  func.func @_identity_copy_kernel(%arg0: memref<2x4x16x16xf32, #tpu.memory_space<any>>, %arg1: memref<2x4x16x16xf32, #tpu.memory_space<any>>, %arg2: memref<!tpu.dma_semaphore, #tpu.memory_space<semaphore_mem>>) attributes {dimension_semantics = [], scalar_prefetch = 0 : i64, scratch_operands = 1 : i64, tpu.core_type = #tpu.core_type<tc>} {
    tpu.enqueue_dma source(%arg0 : memref<2x4x16x16xf32, #tpu.memory_space<any>>) target(%arg1 : memref<2x4x16x16xf32, #tpu.memory_space<any>>) target_semaphore(%arg2 : memref<!tpu.dma_semaphore, #tpu.memory_space<semaphore_mem>>)
    tpu.wait_dma2 semaphore(%arg2 : memref<!tpu.dma_semaphore, #tpu.memory_space<semaphore_mem>>) src(%arg0 : memref<2x4x16x16xf32, #tpu.memory_space<any>>) dst(%arg1 : memref<2x4x16x16xf32, #tpu.memory_space<any>>)
    return
  }
}

</mosaic_0001>

<bundles_post_ra>
// kernel: tpu_custom_call.1
= control target key start
LH: loop header
LB: loop body
LE: loop exit
PB: predicated region body
PF: predicated region fallthrough
CT: control target
= control target key end

     0   :  { %s34_s12 = smov [#allocation2]   ;;  %s35_s13 = smov [#allocation3]   ;;  %s53_s0 = inlined_call_operand.hbm [shape: f32[2,4,16,16], index: 0, kind: input, shape index: {}]   ;;  %s54_s1 = inlined_call_operand.hbm [shape: f32[2,4,16,16], index: 1, kind: output, shape index: {}]  }
   0x1   :  { %s10_s8 = sshll.u32 %s53_s0, 4  ;;  %s12_s11 = sshll.u32 %s54_s1, 4  ;;  %s11_s8 = int_to_ptr.hbm [resolvable:$true] %s10_s8  ;;  %s13_s11 = int_to_ptr.hbm [resolvable:$true] %s12_s11 }
   0x2   :  { %s36_s14 = smov 0  }
   0x3   :  { %16 = dma.general %s11_s8, 2048, %s13_s11, %s34_s12, %s35_s13, [#allocation4], %s36_s14, 0  }
   0x4   :  { %32 = dma.done.wait [#allocation2], 2048 }
   0x5   :  { %33 = vsyncadd [#allocation2], 4294965248 }
   0x6   :  { %22 = vsyncmov [#allocation2] }
   0x9   :  { %s23_s15 = vpop.sfrf %22 }
   0xa   :  { %p28_p0 = scmp.ne.s32.totalorder %s23_s15, 0 }
   0xc   :  { %27 = shalt.err (%p28_p0)  }

</bundles_post_ra>
